<compile_context>
chip_gen: v5e
topology: v5e:2x2
jax: 0.10.0
libtpu: 0.0.40
codegen_flags: <defaults>
</compile_context>

<pallas_src>
import functools

import numpy as np
import jax
import jax.numpy as jnp
from jax.experimental import pallas as pl
from jax.experimental.pallas import tpu as pltpu


def _pick_tile(dim, candidates=(512, 256, 128)):
    """Largest candidate that evenly divides `dim`; else the full dim (always legal)."""
    for c in candidates:
        if dim % c == 0:
            return c
    return dim  # full-extent block (fine for small/odd dims; big dims should be padded)


# ----------------------------------------------------------------------------
# Tiled quaternion linear:  out = x @ W_ham + b
# ----------------------------------------------------------------------------
def _linear_kernel(x_ref, w_ref, b_ref, o_ref, acc_ref):
    @pl.when(pl.program_id(2) == 0)
    def _():
        acc_ref[...] = jnp.zeros_like(acc_ref)

    # Native-dtype tiles on the MXU, f32 accumulation.
    acc_ref[...] += jnp.dot(x_ref[...], w_ref[...],
                            preferred_element_type=jnp.float32)

    @pl.when(pl.program_id(2) == pl.num_programs(2) - 1)
    def _():
        o_ref[...] = (acc_ref[...] + b_ref[...].astype(jnp.float32)).astype(o_ref.dtype)


def quaternion_linear(x2d, w_full, bias):
    """(M, K) @ (K, Nout) + bias, tiled over (M, Nout, K) with an f32 accumulator."""
    M, K = x2d.shape
    K2, n_out = w_full.shape
    assert K == K2
    tm = _pick_tile(M)
    tn = _pick_tile(n_out)
    tk = _pick_tile(K)
    grid = (M // tm, n_out // tn, K // tk)

    cost = pl.CostEstimate(
        flops=2 * M * K * n_out,
        transcendentals=0,
        bytes_accessed=(M * K + K * n_out + M * n_out + n_out) * x2d.dtype.itemsize,
    )

    return pl.pallas_call(
        _linear_kernel,
        out_shape=jax.ShapeDtypeStruct((M, n_out), x2d.dtype),
        grid=grid,
        in_specs=[
            pl.BlockSpec((tm, tk), lambda i, j, k: (i, k)),
            pl.BlockSpec((tk, tn), lambda i, j, k: (k, j)),
            pl.BlockSpec((1, tn), lambda i, j, k: (0, j)),
        ],
        out_specs=pl.BlockSpec((tm, tn), lambda i, j, k: (i, j)),
        scratch_shapes=[pltpu.VMEM((tm, tn), jnp.float32)],
        compiler_params=pltpu.CompilerParams(
            dimension_semantics=("parallel", "parallel", "arbitrary")),
        cost_estimate=cost,
    )(x2d, w_full, bias.reshape(1, n_out))


# ----------------------------------------------------------------------------
# Flash-style quaternion attention core (per-component online softmax)
# ----------------------------------------------------------------------------
def _qattn_flash_kernel(q_ref, k_ref, v_ref, o_ref, m_ref, l_ref, acc_ref, *, scale):
    ki = pl.program_id(3)

    @pl.when(ki == 0)
    def _():
        m_ref[...] = jnp.full_like(m_ref, -1e30)
        l_ref[...] = jnp.zeros_like(l_ref)
        acc_ref[...] = jnp.zeros_like(acc_ref)

    tq, hd = q_ref.shape
    tk = k_ref.shape[0]
    d4 = hd // 4

    q = q_ref[...]                     # (tq, hd)  native dtype (bf16/f32) -> MXU directly
    k = k_ref[...]                     # (tk, hd)
    v = v_ref[...]                     # (tk, hd)

    kr, kx, ky, kz = (k[:, 0:d4], k[:, d4:2 * d4], k[:, 2 * d4:3 * d4], k[:, 3 * d4:4 * d4])
    vr, vx, vy, vz = (v[:, 0:d4], v[:, d4:2 * d4], v[:, 2 * d4:3 * d4], v[:, 3 * d4:4 * d4])

    # Hamilton-product "K" operand: row block c produces score component c, so ONE fused
    # MXU matmul replaces the 16 tiny per-component matmuls (contraction depth hd, not hd/4).
    k_ham = jnp.concatenate([
        jnp.concatenate([kr, -kx, -ky, -kz], axis=-1),   # -> s_r
        jnp.concatenate([kx,  kr,  kz, -ky], axis=-1),   # -> s_i
        jnp.concatenate([ky, -kz,  kr,  kx], axis=-1),   # -> s_j
        jnp.concatenate([kz,  ky, -kx,  kr], axis=-1),   # -> s_k
    ], axis=0)                                            # (4*tk, hd)

    # Signed/permuted V operand per attention component: o += attn_c @ v_ham[c].
    v_ham = (
        jnp.concatenate([vr,  vx,  vy,  vz], axis=-1),    # a_r coefficients
        jnp.concatenate([-vx, vr, -vz,  vy], axis=-1),    # a_i
        jnp.concatenate([-vy, vz,  vr, -vx], axis=-1),    # a_j
        jnp.concatenate([-vz, -vy, vx,  vr], axis=-1),    # a_k
    )

    # Fused score matmul on the MXU; scale applied to the f32 scores.
    s = jax.lax.dot_general(q, k_ham, (((1,), (1,)), ((), ())),
                            preferred_element_type=jnp.float32) * scale   # (tq, 4*tk)

    # Online softmax: a single running max shared across the 4 components (valid since
    # it upper-bounds each component's max), per-component denominators/accumulators.
    m_prev = m_ref[...]                                               # (tq, 1)
    m_new = jnp.maximum(m_prev, jnp.max(s, axis=-1, keepdims=True))
    alpha = jnp.exp(m_prev - m_new)                                   # (tq, 1)
    p = jnp.exp(s - m_new)                                            # (tq, 4*tk) f32
    m_ref[...] = m_new

    p_mm = p.astype(v.dtype)
    for c in range(4):
        pc = p[:, c * tk:(c + 1) * tk]
        l_ref[:, c:c + 1] = alpha * l_ref[:, c:c + 1] + jnp.sum(pc, axis=-1, keepdims=True)
        acc_ref[c] = alpha * acc_ref[c] + jnp.dot(
            p_mm[:, c * tk:(c + 1) * tk], v_ham[c],
            preferred_element_type=jnp.float32)

    @pl.when(ki == pl.num_programs(3) - 1)
    def _():
        # Per-component normalization: reciprocal + multiply (no full-matrix divide).
        # approx=True is usable when bf16-level accuracy suffices.
        out = acc_ref[0] * pl.reciprocal(l_ref[:, 0:1], approx=False)
        for c in range(1, 4):
            out = out + acc_ref[c] * pl.reciprocal(l_ref[:, c:c + 1], approx=False)
        o_ref[...] = out.astype(o_ref.dtype)


def quaternion_attention_core(q, k, v, scale):
    B, H, N, hd = q.shape
    assert hd % 4 == 0, "head_dim must be divisible by 4 (quaternion components)"
    tq = _pick_tile(N, (256, 128))
    tk = _pick_tile(N, (256, 128))
    grid = (B, H, N // tq, N // tk)

    q_spec = pl.BlockSpec((None, None, tq, hd), lambda b, h, qi, ki: (b, h, qi, 0))
    kv_spec = pl.BlockSpec((None, None, tk, hd), lambda b, h, qi, ki: (b, h, ki, 0))
    o_spec = pl.BlockSpec((None, None, tq, hd), lambda b, h, qi, ki: (b, h, qi, 0))

    cost = pl.CostEstimate(
        flops=16 * B * H * N * N * hd,            # fused scores + 4 PV matmuls
        transcendentals=4 * B * H * N * N,        # component exps
        bytes_accessed=4 * B * H * N * hd * q.dtype.itemsize,
    )

    # TODO(synk): for narrow head_dim (<128 lanes) fold all heads into one program with a
    # (tq, H*hd) lane-dense output block to avoid masked partial stores.
    return pl.pallas_call(
        functools.partial(_qattn_flash_kernel, scale=scale),
        out_shape=jax.ShapeDtypeStruct((B, H, N, hd), q.dtype),
        grid=grid,
        in_specs=[q_spec, kv_spec, kv_spec],
        out_specs=o_spec,
        scratch_shapes=[
            pltpu.VMEM((tq, 1), jnp.float32),      # shared running max
            pltpu.VMEM((tq, 4), jnp.float32),      # per-component softmax denominators
            pltpu.VMEM((4, tq, hd), jnp.float32),  # per-component output accumulators
        ],
        compiler_params=pltpu.CompilerParams(
            dimension_semantics=("parallel", "parallel", "parallel", "arbitrary")),
        cost_estimate=cost,
    )(q, k, v)


# ----------------------------------------------------------------------------
# Module-level forward (glue in plain JAX, hot paths in Pallas)
# ----------------------------------------------------------------------------
def attention_forward(x, params, num_heads):
    B, N, C = x.shape
    assert C % num_heads == 0
    hd = C // num_heads
    scale = float(hd) ** -0.5

    x2d = x.reshape(B * N, C)
    qkv = quaternion_linear(x2d, params["w_qkv"], params["b_qkv"])          # (B*N, 3C)
    qkv = qkv.reshape(B, N, 3, num_heads, hd).transpose(2, 0, 3, 1, 4)       # (3,B,H,N,hd)
    q, k, v = qkv[0], qkv[1], qkv[2]
    # q_norm / k_norm are nn.Identity (qk_norm=False); attn_drop/proj_drop are p=0.

    o = quaternion_attention_core(q, k, v, scale)                            # (B,H,N,hd)
    o = o.transpose(0, 2, 1, 3).reshape(B * N, C)
    out = quaternion_linear(o, params["w_proj"], params["b_proj"])
    return out.reshape(B, N, C)


# ----------------------------------------------------------------------------
# Parameter construction (deterministic, Parcollet-style quaternion kernel assembly)
# ----------------------------------------------------------------------------
def _assemble_quaternion_kernel(wr, wi, wj, wk):
    row_r = jnp.concatenate([wr, -wi, -wj, -wk], axis=0)
    row_i = jnp.concatenate([wi, wr, -wk, wj], axis=0)
    row_j = jnp.concatenate([wj, wk, wr, -wi], axis=0)
    row_k = jnp.concatenate([wk, -wj, wi, wr], axis=0)
    return jnp.concatenate([row_r, row_i, row_j, row_k], axis=1)  # (in, out)


def make_quaternion_linear_params(key, in_features, out_features, use_bias):
    in4, out4 = in_features // 4, out_features // 4
    kr, ki, kj, kk, kb = jax.random.split(key, 5)
    s = 1.0 / np.sqrt(in_features)
    wr = jax.random.normal(kr, (in4, out4), jnp.float32) * s
    wi = jax.random.normal(ki, (in4, out4), jnp.float32) * s
    wj = jax.random.normal(kj, (in4, out4), jnp.float32) * s
    wk = jax.random.normal(kk, (in4, out4), jnp.float32) * s
    w_full = _assemble_quaternion_kernel(wr, wi, wj, wk)
    if use_bias:
        b = jax.random.normal(kb, (out_features,), jnp.float32) * 0.01
    else:
        b = jnp.zeros((out_features,), jnp.float32)
    return w_full, b


# ----------------------------------------------------------------------------
# Pure-JAX reference for verification
# ----------------------------------------------------------------------------
def reference_forward(x, params, num_heads):
    B, N, C = x.shape
    hd = C // num_heads
    scale = float(hd) ** -0.5
    qkv = x.reshape(B * N, C) @ params["w_qkv"] + params["b_qkv"]
    qkv = qkv.reshape(B, N, 3, num_heads, hd).transpose(2, 0, 3, 1, 4)
    q, k, v = qkv[0], qkv[1], qkv[2]
    q = q * scale

    def chunk4(a):
        return jnp.split(a, 4, axis=-1)

    qr, qx, qy, qz = chunk4(q)
    kr, kx, ky, kz = chunk4(k)
    mT = lambda a: jnp.swapaxes(a, -2, -1)
    s_r = qr @ mT(kr) - qx @ mT(kx) - qy @ mT(ky) - qz @ mT(kz)
    s_i = qr @ mT(kx) + qx @ mT(kr) + qy @ mT(kz) - qz @ mT(ky)
    s_j = qr @ mT(ky) - qx @ mT(kz) + qy @ mT(kr) + qz @ mT(kx)
    s_k = qr @ mT(kz) + qx @ mT(ky) - qy @ mT(kx) + qz @ mT(kr)
    sm = lambda s: jax.nn.softmax(s, axis=-1)
    a_r, a_i, a_j, a_k = sm(s_r), sm(s_i), sm(s_j), sm(s_k)
    vr, vx, vy, vz = chunk4(v)
    o_r = a_r @ vr - a_i @ vx - a_j @ vy - a_k @ vz
    o_i = a_r @ vx + a_i @ vr + a_j @ vz - a_k @ vy
    o_j = a_r @ vy - a_i @ vz + a_j @ vr + a_k @ vx
    o_k = a_r @ vz + a_i @ vy - a_j @ vx + a_k @ vr
    o = jnp.concatenate([o_r, o_i, o_j, o_k], axis=-1)        # (B,H,N,hd)
    o = o.transpose(0, 2, 1, 3).reshape(B * N, C)
    out = o @ params["w_proj"] + params["b_proj"]
    return out.reshape(B, N, C)


# ----------------------------------------------------------------------------
if __name__ == "__main__":
    B, N, dim, num_heads = 2, 8, 64, 2   # head_dim = 32, quaternion component dim = 8

    key = jax.random.PRNGKey(0)
    kx, kqkv, kproj = jax.random.split(key, 3)

    x = jax.random.normal(kx, (B, N, dim), jnp.float32)

    w_qkv, b_qkv = make_quaternion_linear_params(kqkv, dim, dim * 3, use_bias=False)
    w_proj, b_proj = make_quaternion_linear_params(kproj, dim, dim, use_bias=True)
    params = {"w_qkv": w_qkv, "b_qkv": b_qkv, "w_proj": w_proj, "b_proj": b_proj}

    out = attention_forward(x, params, num_heads)
    out = jax.block_until_ready(out)

    ref = jax.block_until_ready(reference_forward(x, params, num_heads))
    np.testing.assert_allclose(np.asarray(out), np.asarray(ref), rtol=1e-4, atol=1e-4)

    print("KERNEL_OK")
</pallas_src>

<mosaic_0001>
module attributes {stable_mosaic.version = 11 : i64} {
  func.func @_linear_kernel(%arg0: i32, %arg1: i32, %arg2: i32, %arg3: memref<16x64xf32, #tpu.memory_space<vmem>>, %arg4: memref<64x192xf32, #tpu.memory_space<vmem>>, %arg5: memref<1x192xf32, #tpu.memory_space<vmem>>, %arg6: memref<16x192xf32, #tpu.memory_space<vmem>>, %arg7: memref<16x192xf32, #tpu.memory_space<vmem>>) attributes {dimension_semantics = [#tpu.dimension_semantics<parallel>, #tpu.dimension_semantics<parallel>, #tpu.dimension_semantics<arbitrary>], iteration_bounds = array<i64: 1, 1, 1>, scalar_prefetch = 0 : i64, scratch_operands = 1 : i64, tpu.core_type = #tpu.core_type<tc>, window_params = [{transform_indices = @transform_0, window_bounds = array<i64: 16, 64>}, {transform_indices = @transform_1, window_bounds = array<i64: 64, 192>}, {transform_indices = @transform_2, window_bounds = array<i64: 1, 192>}, {transform_indices = @transform_3, window_bounds = array<i64: 16, 192>}]} {
    %c0_i32 = arith.constant 0 : i32
    %0 = arith.cmpi eq, %arg2, %c0_i32 : i32
    %1 = arith.extui %0 : i1 to i32
    %c0_i32_0 = arith.constant 0 : i32
    %2 = arith.cmpi ne, %1, %c0_i32_0 : i32
    scf.if %2 {
      %cst_10 = arith.constant 0.000000e+00 : f32
      %12 = vector.broadcast %cst_10 : f32 to vector<16x192xf32>
      %c0_11 = arith.constant 0 : index
      %c0_12 = arith.constant 0 : index
      %13 = vector.load %arg7[%c0_11, %c0_12] : memref<16x192xf32, #tpu.memory_space<vmem>>, vector<16x192xf32>
      tpu.vector_store %arg7[%c0_11, %c0_12], %12 {strides = array<i32>} : memref<16x192xf32, #tpu.memory_space<vmem>>, vector<16x192xf32>,
    } else {
    }
    %c0 = arith.constant 0 : index
    %c0_1 = arith.constant 0 : index
    %3 = vector.load %arg7[%c0, %c0_1] : memref<16x192xf32, #tpu.memory_space<vmem>>, vector<16x192xf32>
    %c0_2 = arith.constant 0 : index
    %c0_3 = arith.constant 0 : index
    %4 = vector.load %arg3[%c0_2, %c0_3] : memref<16x64xf32, #tpu.memory_space<vmem>>, vector<16x64xf32>
    %c0_4 = arith.constant 0 : index
    %c0_5 = arith.constant 0 : index
    %5 = vector.load %arg4[%c0_4, %c0_5] : memref<64x192xf32, #tpu.memory_space<vmem>>, vector<64x192xf32>
    %cst = arith.constant dense<0.000000e+00> : vector<16x192xf32>
    %6 = tpu.matmul %4, %5, %cst {dimension_numbers = #tpu.dot_dimension_numbers<[1], [0], [0], [1], [0, 0, 1, 1], [], []>} : vector<16x64xf32>, vector<64x192xf32>, vector<16x192xf32> -> vector<16x192xf32>
    %7 = arith.addf %3, %6 : vector<16x192xf32>
    %c0_6 = arith.constant 0 : index
    %c0_7 = arith.constant 0 : index
    %8 = vector.load %arg7[%c0_6, %c0_7] : memref<16x192xf32, #tpu.memory_space<vmem>>, vector<16x192xf32>
    tpu.vector_store %arg7[%c0_6, %c0_7], %7 {strides = array<i32>} : memref<16x192xf32, #tpu.memory_space<vmem>>, vector<16x192xf32>,
    %c0_i32_8 = arith.constant 0 : i32
    %9 = arith.cmpi eq, %arg2, %c0_i32_8 : i32
    %10 = arith.extui %9 : i1 to i32
    %c0_i32_9 = arith.constant 0 : i32
    %11 = arith.cmpi ne, %10, %c0_i32_9 : i32
    scf.if %11 {
      %c0_10 = arith.constant 0 : index
      %c0_11 = arith.constant 0 : index
      %12 = vector.load %arg7[%c0_10, %c0_11] : memref<16x192xf32, #tpu.memory_space<vmem>>, vector<16x192xf32>
      %c0_12 = arith.constant 0 : index
      %c0_13 = arith.constant 0 : index
      %13 = vector.load %arg5[%c0_12, %c0_13] : memref<1x192xf32, #tpu.memory_space<vmem>>, vector<1x192xf32>
      %14 = vector.broadcast %13 : vector<1x192xf32> to vector<16x192xf32>
      %15 = arith.addf %12, %14 : vector<16x192xf32>
      %c0_14 = arith.constant 0 : index
      %c0_15 = arith.constant 0 : index
      %16 = vector.load %arg6[%c0_14, %c0_15] : memref<16x192xf32, #tpu.memory_space<vmem>>, vector<16x192xf32>
      tpu.vector_store %arg6[%c0_14, %c0_15], %15 {strides = array<i32>} : memref<16x192xf32, #tpu.memory_space<vmem>>, vector<16x192xf32>,
    } else {
    }
    return
  }
  func.func @transform_0(%arg0: i32, %arg1: i32, %arg2: i32) -> (i32, i32) {
    %c0_i32 = arith.constant 0 : i32
    return %arg0, %arg2 : i32, i32
  }
  func.func @transform_1(%arg0: i32, %arg1: i32, %arg2: i32) -> (i32, i32) {
    %c0_i32 = arith.constant 0 : i32
    return %arg2, %arg1 : i32, i32
  }
  func.func @transform_2(%arg0: i32, %arg1: i32, %arg2: i32) -> (i32, i32) {
    %c0_i32 = arith.constant 0 : i32
    %c0_i32_0 = arith.constant 0 : i32
    return %c0_i32, %arg1 : i32, i32
  }
  func.func @transform_3(%arg0: i32, %arg1: i32, %arg2: i32) -> (i32, i32) {
    %c0_i32 = arith.constant 0 : i32
    return %arg0, %arg1 : i32, i32
  }
}

</mosaic_0001>

<bundles_post_ra>
// kernel: tpu_custom_call.1
= control target key start
LH: loop header
LB: loop body
LE: loop exit
PB: predicated region body
PF: predicated region fallthrough
CT: control target
= control target key end

     0   :  { %8 = vsyncpa [#allocation4], 0  ;;  %s381_s0 = inlined_call_operand.hbm [shape: f32[16,64], index: 0, kind: input, shape index: {}]   ;;  %s382_s1 = inlined_call_operand.hbm [shape: f32[64,192], index: 1, kind: input, shape index: {}]   ;;  %s383_s2 = inlined_call_operand.hbm [shape: f32[1,192], index: 2, kind: input, shape index: {}]   ;;  %s384_s3 = inlined_call_operand.hbm [shape: f32[16,192], index: 3, kind: output, shape index: {}]  }
   0x1   :  { %9 = vsyncpa [#allocation7], 0  ;;  %s28_s14 = sshll.u32 %s382_s1, 4  ;;  %s29_s14 = int_to_ptr.hbm [resolvable:$true] %s28_s14 }
   0x2   :  { %10 = vsyncpa [#allocation5], 0  ;;  %s324_s15 = smov [#allocation6]   ;;  %s15_s19 = sshll.u32 %s381_s0, 4  ;;  %s16_s19 = int_to_ptr.hbm [resolvable:$true] %s15_s19 }
   0x3   :  { %s30_s16 = sshll.u32 %s324_s15, 4  ;;  %s325_s20 = smov 256   ;;  %s31_s16 = int_to_ptr.vmem [resolvable:$true] %s30_s16 }
   0x4   :  { %s326_s21 = smov 16   ;;  %s327_s22 = smov [#allocation3]  }
   0x5   :  { %36 = dma.hbm_to_vmem [thread:$0]  %s29_s14, 2048, %s31_s16, [#allocation7], %s325_s20, %s325_s20, %s326_s21  }
   0x6   :  { %s17_s23 = sshll.u32 %s327_s22, 4  ;;  %s328_s1 = smov 128   ;;  %s18_s23 = int_to_ptr.vmem [resolvable:$true] %s17_s23 }
   0x7   :  { %s329_s24 = smov 8   ;;  %s42_s27 = sshll.u32 %s383_s2, 4  ;;  %s43_s27 = int_to_ptr.hbm [resolvable:$true] %s42_s27 }
   0x8   :  { %23 = dma.hbm_to_vmem [thread:$0]  %s16_s19, 256, %s18_s23, [#allocation4], %s328_s1, %s328_s1, %s329_s24  }
   0x9   :  { %s330_s28 = smov [#allocation8]  }
   0xa   :  { %s44_s0 = sshll.u32 %s330_s28, 4  ;;  %s45_s0 = int_to_ptr.vmem [resolvable:$true] %s44_s0 }
   0xb   :  { %47 = dma.hbm_to_vmem [thread:$0]  %s43_s27, 32, %s45_s0, [#allocation7]  }
   0xc   :  { %318 = dma.done.wait [#allocation4], 256  }
   0xd   :  { %319 = vsyncadd [#allocation4], 4294967040 }
   0xe   :  { %320 = dma.done.wait [#allocation7], 2080  }
   0xf   :  { %321 = vsyncadd [#allocation7], 4294965216  ;;  %vm65_vm0 = vcmask 523264   ;;  %v331_v0 = vmov 0.0   ;;  %v89_v1 = vld [vmem:[#allocation6 + $0x70] sm:$0xff]  ;;  %v90_v2 = vld [vmem:[#allocation6 + $0x78] sm:$0xff] }
  0x10   :  { %66 = vst.msk [vmem:[#allocation2 + $0x8] sm:$0xff] %vm65_vm0, %v331_v0  ;;  %v87_v3 = vld [vmem:[#allocation6 + $0x60] sm:$0xff]  ;;  %197 = vmatpush.msra.mxu2 %v89_v1  ;;  %205 = vmatpush.msra.mxu3 %v90_v2  ;;  %v88_v4 = vld [vmem:[#allocation6 + $0x68] sm:$0xff]  ;;  %v85_v5 = vld [vmem:[#allocation6 + $0x50] sm:$0xff]  ;;  %s332_s2 = smov [#allocation9]   ;;  %s179_s5 = sshll.u32 %s384_s3, 4  ;;  %s180_s5 = int_to_ptr.hbm [resolvable:$true] %s179_s5 }
  0x11   :  { %68 = vst.msk [vmem:[#allocation2 + $0x18] sm:$0xff] %vm65_vm0, %v331_v0  ;;  %v86_v6 = vld [vmem:[#allocation6 + $0x58] sm:$0xff]  ;;  %106 = vmatpush.msra.mxu0 %v89_v1  ;;  %129 = vmatpush.msra.mxu1 %v90_v2  ;;  %v83_v7 = vld [vmem:[#allocation6 + $0x40] sm:$0xff]  ;;  %v84_v8 = vld [vmem:[#allocation6 + $0x48] sm:$0xff]  ;;  %s177_s29 = sshll.u32 %s332_s2, 4  ;;  %s178_s29 = int_to_ptr.vmem [resolvable:$true] %s177_s29 }
  0x12   :  { %198 = vmatpush.msra.mxu2 %v87_v3  ;;  %206 = vmatpush.msra.mxu3 %v88_v4  ;;  %v81_v9 = vld [vmem:[#allocation6 + $0x30] sm:$0xff]  ;;  %v82_v10 = vld [vmem:[#allocation6 + $0x38] sm:$0xff]  ;;  %v79_v11 = vld [vmem:[#allocation6 + $0x20] sm:$0xff] }
  0x13   :  { %107 = vmatpush.msra.mxu0 %v87_v3  ;;  %130 = vmatpush.msra.mxu1 %v88_v4  ;;  %v80_v12 = vld [vmem:[#allocation6 + $0x28] sm:$0xff]  ;;  %v77_v13 = vld [vmem:[#allocation6 + $0x10] sm:$0xff]  ;;  %v78_v14 = vld [vmem:[#allocation6 + $0x18] sm:$0xff] }
  0x14   :  { %199 = vmatpush.msra.mxu2 %v85_v5  ;;  %207 = vmatpush.msra.mxu3 %v86_v6  ;;  %v75_v15 = vld [vmem:[#allocation6] sm:$0xff]  ;;  %v76_v16 = vld [vmem:[#allocation6 + $0x8] sm:$0xff]  ;;  %v74_v17 = vld [vmem:[#allocation3 + $0x8] sm:$0xff] }
  0x15   :  { %108 = vmatpush.msra.mxu0 %v85_v5  ;;  %131 = vmatpush.msra.mxu1 %v86_v6  ;;  %v73_v18 = vld [vmem:[#allocation3] sm:$0xff]  ;;  %v159_v19 = vld [vmem:[#allocation8] sm:$0x3] }
  0x16   :  { %200 = vmatpush.msra.mxu2 %v83_v7  ;;  %208 = vmatpush.msra.mxu3 %v84_v8  ;;  %v161_v21 = vperm.slane %v159_v19, 0  ;;  %v162_v31 = vperm.slane %v159_v19, 1 }
  0x17   :  { %109 = vmatpush.msra.mxu0 %v83_v7  ;;  %132 = vmatpush.msra.mxu1 %v84_v8  ;;  %v70_v20 = vld [vmem:[#allocation2 + $0x8] sm:$0xff] }
  0x18   :  { %201 = vmatpush.msra.mxu2 %v81_v9  ;;  %209 = vmatpush.msra.mxu3 %v82_v10  ;;  %v72_v25 = vld [vmem:[#allocation2 + $0x18] sm:$0xff] }
  0x19   :  { %110 = vmatpush.msra.mxu0 %v81_v9  ;;  %133 = vmatpush.msra.mxu1 %v82_v10 }
  0x1a   :  { %202 = vmatpush.msra.mxu2 %v79_v11  ;;  %210 = vmatpush.msra.mxu3 %v80_v12 }
  0x1b   :  { %111 = vmatpush.msra.mxu0 %v79_v11  ;;  %134 = vmatpush.msra.mxu1 %v80_v12 }
  0x1c   :  { %203 = vmatpush.msra.mxu2 %v77_v13  ;;  %211 = vmatpush.msra.mxu3 %v78_v14 }
  0x1d   :  { %112 = vmatpush.msra.mxu0 %v77_v13  ;;  %135 = vmatpush.msra.mxu1 %v78_v14 }
  0x1e   :  { %204 = vmatpush.msra.mxu2 %v75_v15  ;;  %212 = vmatpush.msra.mxu3 %v76_v16 }
  0x1f   :  { %194 = vmatmul.msk.f32.vlgmr.msra.gmra.mxu2 %vm65_vm0, %v74_v17  ;;  %196 = vmatmul.msk.f32.vlgmr.msra.gmra.mxu3 %vm65_vm0, %v74_v17 }
  0x20   :  { %113 = vmatpush.msra.mxu0 %v75_v15  ;;  %136 = vmatpush.msra.mxu1 %v76_v16 }
  0x21   :  { %193 = vmatmul.msk.f32.vlgmr.msra.gmra.mxu0 %vm65_vm0, %v73_v18  ;;  %195 = vmatmul.msk.f32.vlgmr.msra.gmra.mxu1 %vm65_vm0, %v73_v18 }
  0x9e   :  { %v115_v22 = vpop.f32.mrf.mxu0  ;;  %v138_v23 = vpop.f32.mrf.mxu1 }
  0x9f   :  { %v145_v24 = vadd.f32 %v138_v23, %v70_v20  ;;  %v165_v26 = vadd.f32 %v161_v21, %v115_v22 }
  0xa1   :  { %149 = vst.msk [vmem:[#allocation2 + $0x8] sm:$0xff] %vm65_vm0, %v145_v24 }
  0xa2   :  { %v118_v27 = vpop.f32.mrf.mxu2  ;;  %v141_v28 = vpop.f32.mrf.mxu3  ;;  %169 = vst [vmem:[#allocation9] sm:$0xff] %v165_v26 }
  0xa3   :  { %v147_v29 = vadd.f32 %v141_v28, %v72_v25  ;;  %v167_v30 = vadd.f32 %v161_v21, %v118_v27 }
  0xa5   :  { %151 = vst.msk [vmem:[#allocation2 + $0x18] sm:$0xff] %vm65_vm0, %v147_v29 }
  0xa6   :  { %171 = vst [vmem:[#allocation9 + $0x10] sm:$0xff] %v167_v30 }
  0xa8   :  { %v156_v32 = vld [vmem:[#allocation2 + $0x8] sm:$0xff] }
  0xa9   :  { %v166_v33 = vadd.f32 %v162_v31, %v156_v32 }
  0xab   :  { %170 = vst.msk [vmem:[#allocation9 + $0x8] sm:$0xff] %vm65_vm0, %v166_v33 }
  0xac   :  { %v158_v34 = vld [vmem:[#allocation2 + $0x18] sm:$0xff] }
  0xad   :  { %v168_v35 = vadd.f32 %v162_v31, %v158_v34 }
  0xaf   :  { %172 = vst.msk [vmem:[#allocation9 + $0x18] sm:$0xff] %vm65_vm0, %v168_v35 }
  0xb0   :  { %185 = dma.vmem_to_hbm [thread:$0]  %s178_s29, 512, %s180_s5, [#allocation5], %s325_s20, %s325_s20, %s326_s21  }
  0xb1   :  { %322 = dma.done.wait [#allocation5], 512  }
  0xb2   :  { %323 = vsyncadd [#allocation5], 4294966784 }
  0xb3   :  { %190 = vsyncpa [#allocation4], 1 }
  0xb4   :  { %191 = vsyncpa [#allocation7], 1 }
  0xb5   :  { %192 = vsyncpa [#allocation5], 1 }

</bundles_post_ra>
